<compile_context>
chip_gen: v7x
topology: tpu7x:2x2x1
jax: 0.10.0
libtpu: 0.0.40
codegen_flags: <defaults>
</compile_context>

<pallas_src>
import jax
import jax.numpy as jnp
from jax import lax
from jax.experimental import pallas as pl
from jax.experimental.pallas import tpu as pltpu


def _triaffine_kernel(s_ref, e_ref, c_ref, w_ref, o_ref):
    tx, H = s_ref.shape          # (tx, H_i)
    Y = e_ref.shape[0]           # (Y, H_j)
    Z = c_ref.shape[0]           # (Z, H_o)

    s = s_ref[...]
    e = e_ref[...]
    c = c_ref[...]
    w2 = w_ref[...]              # (H_i, H_o*H_j), w2[i, o*H + j] = W[i, o, j]

    # (1) t1[x, o*H + j] = sum_i s[x, i] * W[i, o, j]  — single lane-dense MXU matmul
    t1 = jnp.dot(s, w2, preferred_element_type=jnp.float32)          # (tx, H*H)

    # (2) t2[x, o, y] = sum_j t1[x, o, j] * e[y, j]
    t2 = lax.dot_general(
        t1.reshape(tx, H, H), e,
        (((2,), (1,)), ((), ())),
        preferred_element_type=jnp.float32,
    )                                                                # (tx, H_o, Y)

    # (3) out[x, y, z] = sum_o t2[x, o, y] * c[z, o]
    out = lax.dot_general(
        t2, c,
        (((1,), (1,)), ((), ())),
        preferred_element_type=jnp.float32,
    )                                                                # (tx, Y, Z)

    # Fold (Y, Z) into lanes so the store is as lane-dense as possible.
    o_ref[...] = out.reshape(tx, Y * Z).astype(o_ref.dtype)


def triaffine(start_logits, end_logits, cls_logits, weight_start_end):
    """start (B,X,H), end (B,Y,H), cls (B,Z,H), weight (H,H,H) -> (B,X,Y,Z)."""
    B, X, H = start_logits.shape
    Y = end_logits.shape[1]
    Z = cls_logits.shape[1]
    assert weight_start_end.shape == (H, H, H)

    # Row-major flatten of the trailing (H_o, H_j) dims — free, no data movement.
    w2 = weight_start_end.reshape(H, H * H)

    # Tile the x (start) axis; each tile is fully independent (no redundant work).
    tx = X if X <= 128 else 128
    grid = (B, pl.cdiv(X, tx))

    out2d = pl.pallas_call(
        _triaffine_kernel,
        out_shape=jax.ShapeDtypeStruct((B, X, Y * Z), jnp.float32),
        grid_spec=pltpu.PrefetchScalarGridSpec(
            num_scalar_prefetch=0,
            grid=grid,
            in_specs=[
                pl.BlockSpec((None, tx, H), lambda b, xi: (b, xi, 0)),   # start
                pl.BlockSpec((None, Y, H), lambda b, xi: (b, 0, 0)),     # end
                pl.BlockSpec((None, Z, H), lambda b, xi: (b, 0, 0)),     # cls
                pl.BlockSpec((H, H * H), lambda b, xi: (0, 0)),          # weight
            ],
            out_specs=pl.BlockSpec((None, tx, Y * Z), lambda b, xi: (b, xi, 0)),
        ),
        compiler_params=pltpu.CompilerParams(
            dimension_semantics=("parallel", "parallel"),
        ),
    )(start_logits, end_logits, cls_logits, w2)

    return out2d.reshape(B, X, Y, Z)


def triaffine_ref(start_logits, end_logits, cls_logits, weight_start_end):
    start_end = jnp.einsum(
        "bxi,ioj,byj->bxyo", start_logits, weight_start_end, end_logits
    )
    return jnp.einsum("bxyo,bzo->bxyz", start_end, cls_logits)


if __name__ == "__main__":
    B, S, H = 2, 8, 32  # batch, seq, triaffine_hidden_size

    key = jax.random.PRNGKey(0)
    k_w, k_s, k_e, k_c = jax.random.split(key, 4)

    # nn.init.normal_(weight, mean=0, std=0.1)
    weight_start_end = 0.1 * jax.random.normal(k_w, (H, H, H), dtype=jnp.float32)

    start_logits = jax.random.normal(k_s, (B, S, H), dtype=jnp.float32)
    end_logits = jax.random.normal(k_e, (B, S, H), dtype=jnp.float32)
    cls_logits = jax.random.normal(k_c, (B, S, H), dtype=jnp.float32)

    out = triaffine(start_logits, end_logits, cls_logits, weight_start_end)
    out = jax.block_until_ready(out)

    ref = triaffine_ref(start_logits, end_logits, cls_logits, weight_start_end)
    assert out.shape == (B, S, S, S)
    assert jnp.allclose(out, ref, atol=1e-3, rtol=1e-3)

    print("KERNEL_OK")
</pallas_src>

<mosaic_0001>
module attributes {stable_mosaic.version = 11 : i64} {
  func.func @_triaffine_kernel(%arg0: i32, %arg1: i32, %arg2: memref<1x8x32xf32, #tpu.memory_space<vmem>>, %arg3: memref<1x8x32xf32, #tpu.memory_space<vmem>>, %arg4: memref<1x8x32xf32, #tpu.memory_space<vmem>>, %arg5: memref<32x1024xf32, #tpu.memory_space<vmem>>, %arg6: memref<1x8x64xf32, #tpu.memory_space<vmem>>) attributes {dimension_semantics = [#tpu.dimension_semantics<parallel>, #tpu.dimension_semantics<parallel>], iteration_bounds = array<i64: 2, 1>, scalar_prefetch = 0 : i64, scratch_operands = 0 : i64, tpu.core_type = #tpu.core_type<tc>, window_params = [{transform_indices = @transform_0, window_bounds = array<i64: 1, 8, 32>}, {transform_indices = @transform_1, window_bounds = array<i64: 1, 8, 32>}, {transform_indices = @transform_2, window_bounds = array<i64: 1, 8, 32>}, {pipeline_mode = #tpu.pipeline_mode<synchronous>, transform_indices = @transform_3, window_bounds = array<i64: 32, 1024>}, {transform_indices = @transform_4, window_bounds = array<i64: 1, 8, 64>}]} {
    %c0 = arith.constant 0 : index
    %c0_0 = arith.constant 0 : index
    %c0_1 = arith.constant 0 : index
    %0 = vector.load %arg2[%c0, %c0_0, %c0_1] : memref<1x8x32xf32, #tpu.memory_space<vmem>>, vector<1x8x32xf32>
    %1 = vector.shape_cast %0 : vector<1x8x32xf32> to vector<8x32xf32>
    %c0_2 = arith.constant 0 : index
    %c0_3 = arith.constant 0 : index
    %c0_4 = arith.constant 0 : index
    %2 = vector.load %arg3[%c0_2, %c0_3, %c0_4] : memref<1x8x32xf32, #tpu.memory_space<vmem>>, vector<1x8x32xf32>
    %3 = vector.shape_cast %2 : vector<1x8x32xf32> to vector<8x32xf32>
    %c0_5 = arith.constant 0 : index
    %c0_6 = arith.constant 0 : index
    %c0_7 = arith.constant 0 : index
    %4 = vector.load %arg4[%c0_5, %c0_6, %c0_7] : memref<1x8x32xf32, #tpu.memory_space<vmem>>, vector<1x8x32xf32>
    %5 = vector.shape_cast %4 : vector<1x8x32xf32> to vector<8x32xf32>
    %c0_8 = arith.constant 0 : index
    %c0_9 = arith.constant 0 : index
    %6 = vector.load %arg5[%c0_8, %c0_9] : memref<32x1024xf32, #tpu.memory_space<vmem>>, vector<32x1024xf32>
    %cst = arith.constant dense<0.000000e+00> : vector<8x1024xf32>
    %7 = tpu.matmul %1, %6, %cst {dimension_numbers = #tpu.dot_dimension_numbers<[1], [0], [0], [1], [0, 0, 1, 1], [], []>} : vector<8x32xf32>, vector<32x1024xf32>, vector<8x1024xf32> -> vector<8x1024xf32>
    %8 = vector.shape_cast %7 : vector<8x1024xf32> to vector<8x32x32xf32>
    %cst_10 = arith.constant dense<0.000000e+00> : vector<8x32x8xf32>
    %9 = tpu.matmul %8, %3, %cst_10 {dimension_numbers = #tpu.dot_dimension_numbers<[2], [1], [0, 1], [0], [0, 0, 0, 1, 1, 0], [], []>} : vector<8x32x32xf32>, vector<8x32xf32>, vector<8x32x8xf32> -> vector<8x32x8xf32>
    %cst_11 = arith.constant dense<0.000000e+00> : vector<8x8x8xf32>
    %10 = tpu.matmul %9, %5, %cst_11 {dimension_numbers = #tpu.dot_dimension_numbers<[1], [1], [0, 2], [0], [0, 0, 0, 2, 1, 0], [], []>} : vector<8x32x8xf32>, vector<8x32xf32>, vector<8x8x8xf32> -> vector<8x8x8xf32>
    %11 = vector.shape_cast %10 : vector<8x8x8xf32> to vector<8x64xf32>
    %c0_12 = arith.constant 0 : index
    %c0_13 = arith.constant 0 : index
    %c0_14 = arith.constant 0 : index
    %12 = vector.load %arg6[%c0_12, %c0_13, %c0_14] : memref<1x8x64xf32, #tpu.memory_space<vmem>>, vector<1x8x64xf32>
    %13 = vector.shape_cast %12 : vector<1x8x64xf32> to vector<8x64xf32>
    %14 = vector.shape_cast %11 : vector<8x64xf32> to vector<1x8x64xf32>
    tpu.vector_store %arg6[%c0_12, %c0_13, %c0_14], %14 {strides = array<i32>} : memref<1x8x64xf32, #tpu.memory_space<vmem>>, vector<1x8x64xf32>,
    return
  }
  func.func @transform_0(%arg0: i32, %arg1: i32) -> (i32, i32, i32) {
    %c0_i32 = arith.constant 0 : i32
    %c0_i32_0 = arith.constant 0 : i32
    return %arg0, %arg1, %c0_i32 : i32, i32, i32
  }
  func.func @transform_1(%arg0: i32, %arg1: i32) -> (i32, i32, i32) {
    %c0_i32 = arith.constant 0 : i32
    %c0_i32_0 = arith.constant 0 : i32
    %c0_i32_1 = arith.constant 0 : i32
    return %arg0, %c0_i32, %c0_i32_0 : i32, i32, i32
  }
  func.func @transform_2(%arg0: i32, %arg1: i32) -> (i32, i32, i32) {
    %c0_i32 = arith.constant 0 : i32
    %c0_i32_0 = arith.constant 0 : i32
    %c0_i32_1 = arith.constant 0 : i32
    return %arg0, %c0_i32, %c0_i32_0 : i32, i32, i32
  }
  func.func @transform_3(%arg0: i32, %arg1: i32) -> (i32, i32) {
    %c0_i32 = arith.constant 0 : i32
    %c0_i32_0 = arith.constant 0 : i32
    %c0_i32_1 = arith.constant 0 : i32
    return %c0_i32, %c0_i32_0 : i32, i32
  }
  func.func @transform_4(%arg0: i32, %arg1: i32) -> (i32, i32, i32) {
    %c0_i32 = arith.constant 0 : i32
    %c0_i32_0 = arith.constant 0 : i32
    return %arg0, %arg1, %c0_i32 : i32, i32, i32
  }
}

</mosaic_0001>

<bundles_post_ra>
// kernel: tpu_custom_call.1
= control target key start
LH: loop header
LB: loop body
LE: loop exit
PB: predicated region body
PF: predicated region fallthrough
CT: control target
= control target key end

     0   :  { %s3512_s0 = inlined_call_operand.hbm [shape: f32[2,8,32], index: 0, kind: input, shape index: {}]   ;;  %s3513_s1 = inlined_call_operand.hbm [shape: f32[2,8,32], index: 1, kind: input, shape index: {}]   ;;  %s3514_s2 = inlined_call_operand.hbm [shape: f32[2,8,32], index: 2, kind: input, shape index: {}]   ;;  %s3515_s3 = inlined_call_operand.hbm [shape: f32[32,1024], index: 3, kind: input, shape index: {}]   ;;  %s3516_s4 = inlined_call_operand.hbm [shape: f32[2,8,64], index: 4, kind: output, shape index: {}]  }
   0x1   :  { %3534 = sst [smem:[#allocation21_spill]] %s3513_s1 }
   0x2   :  { %3535 = sst [smem:[#allocation22_spill]] %s3516_s4 }
   0x3   :  { %9 = vsyncpa [#allocation3], 0 }
   0x4   :  { %11 = vsyncpa [#allocation3 + $0x1], 0 }
   0x5   :  { %12 = vsyncpa [#allocation6], 0 }
   0x6   :  { %14 = vsyncpa [#allocation6 + $0x1], 0 }
   0x7   :  { %15 = vsyncpa [#allocation9], 0 }
   0x8   :  { %16 = vsyncpa [#allocation4], 0 }
   0x9   :  { %18 = vsyncpa [#allocation4 + $0x1], 0  ;;  %s2860_s15 = smov 0   ;;  %s2862_s16 = smov 0  }
   0xa   :  { %s2864_s17 = smov 0   ;;  %s2866_s18 = smov 0  }
   0xb   :  { %s2868_s19 = smov 0   ;;  %s2870_s20 = smov 0  }
   0xc LB: > { %3536 = sst [smem:[#allocation15_spill]] %s2794_s15  ;;  %s36_s21 = sadd.s32 1, %s2810_s19  ;;  %s2814_s20 = sphi %s2870_s20, %s24_s20   ;;  %s2810_s19 = sphi %s2868_s19, %s3568_s19   ;;  %s2806_s18 = sphi %s2866_s18, %s3567_s18   ;;  %s2802_s17 = sphi %s2864_s17, %s3571_s17   ;;  %s2798_s16 = sphi %s2862_s16, %s3570_s16   ;;  %s2794_s15 = sphi %s2860_s15, %s3569_s15  }
   0xd   : > { %3537 = sst [smem:[#allocation16_spill]] %s2810_s19  ;;  %s45_s22 = sadd.s32 1, %s2802_s17 }
   0xe   : > { %3538 = sst [smem:[#allocation17_spill]] %s2814_s20  ;;  %p38_p0 = scmp.ge.s32.totalorder %s36_s21, 2 }
   0xf   : > { %p3517_p1 = scmp.ne.s32.totalorder %s2802_s17, %s2798_s16  ;;  %p53_p2 = scmp.eq.s32.totalorder %s2814_s20, 0 }
  0x10   : > { %s3573_s21 = smov (%p38_p0, %s36_s21), 0  ;;  %p2540_p5 = scmp.lt.s32.totalorder %s2814_s20, 2 }
  0x11   : > { %3539 = sst [smem:[#allocation18_spill]] %s3573_s21  ;;  %p54_p4 = por %p53_p2, %p3517_p1 }
  0x12   : > { %s40_s23 = ssub.s32 %s2810_s19, %s3573_s21  ;;  %s3518_s24 = sand.u32 1, %s2802_s17  }
  0x13   : > { %p43_p6 = scmp.eq.s32.totalorder %s40_s23, 0  ;;  %s2907_s25 = sshll.u32 %s3518_s24, 3 }
  0x14   : > { %s2910_s26 = sshll.u32 %s2810_s19, 7  ;;  %p2912_p7 = pnand %p2540_p5, %p54_p4 }
  0x15   : > { %s2917_s28 = scalar_select %p43_p6, %s2802_s17, %s45_s22  }
  0x16   : > { %s3540_s27 = scalar_select %p2912_p7, 1, 0 }
  0x17   : > { %3541 = sst [smem:[#allocation19_spill]] %s2917_s28  ;;  %s215_s29 = sand.u32 1, %s2814_s20  }
  0x18   : > { %s3542_s1 = sld [smem:[#allocation21_spill]]  ;;  %s219_s7 = scalar_lea.vmem [#allocation5], %s2907_s25 }
  0x19   : > { %s226_s8 = sshll.u32 %s219_s7, 4  ;;  %s2929_s9 = scalar_lea.sflag [#allocation6], %s215_s29  ;;  %s2927_s8 = int_to_ptr.vmem [resolvable:$true] %s226_s8 }
  0x1a   : > { %p2935_p9 = pneg %p2912_p7 }
  0x1c   : > { %s3543_s11 = scalar_select %p2935_p9, 1, 0 }
  0x1e   : > { %s2924_s6 = scalar_lea.hbm %s3542_s1, %s2910_s26  ;;  %s2611_s14 = scalar_lea.hbm %s3542_s1, 256 }
  0x1f   : > { %s2606_s10 = scalar_lea.hbm %s2924_s6, 128  ;;  %p2612_p12 = scmp.lt.u32.totalorder %s2924_s6, %s3542_s1 }
  0x20   : > { %p2607_p8 = scmp.ne.s32.totalorder %s2924_s6, %s2606_s10  ;;  %p2613_p13 = scmp.lt.u32.totalorder %s2611_s14, %s2606_s10 }
  0x21   : > { %p2615_p2 = scmp.lt.u32.totalorder %s2606_s10, %s2924_s6 }
  0x22   : > { %p2609_p10 = pnand %p2935_p9, %p2607_p8  ;;  %p2614_p0 = por %p2613_p13, %p2612_p12 }
  0x24   : > { %p2610_p11 = pneg %p2609_p10  ;;  %p2616_p4 = por %p2615_p2, %p2614_p0 }
  0x26   : > { %p2617_p5 = pnand %p2616_p4, %p2610_p11 }
  0x28   : > { %2620 = shalt.err (!%p2617_p5)
}
  0x29   : > { %s2621_s29 = scalar_lea.vmem %s2927_s8, 128  ;;  %s2816_s30 = smov [#allocation5]  }
  0x2a   : > { %p2622_p6 = scmp.ne.s32.totalorder %s2927_s8, %s2621_s29  ;;  %s2626_s5 = sshll.u32 %s2816_s30, 4  ;;  %s2627_s5 = int_to_ptr.vmem [resolvable:$false] %s2626_s5 }
  0x2b   : > { %s2628_s7 = scalar_lea.vmem %s2627_s5, 256  ;;  %p2629_p3 = scmp.lt.s32.totalorder %s2927_s8, %s2627_s5 }
  0x2c   : > { %p2624_p8 = pnand %p2622_p6, %p2935_p9  ;;  %p2630_p1 = scmp.lt.s32.totalorder %s2628_s7, %s2621_s29 }
  0x2e   : > { %p2625_p10 = pneg %p2624_p8  ;;  %p2631_p12 = por %p2630_p1, %p2629_p3 }
  0x30   : > { %p2632_p13 = pnand %p2631_p12, %p2625_p10 }
  0x32   : > { %2635 = shalt.err (!%p2632_p13)
}
  0x33   : > { %2531 = dma.hbm_to_vmem [thread:$0]  (!%p2912_p7), %s2924_s6, 128, %s2927_s8, %s2929_s9  }
  0x34   : > { %s2960_s10 = sadd.s32 4294967295, %s2814_s20   ;;  %s2303_s12 = sadd.s32 4294967294, %s2814_s20  }
  0x35   : > { %p58_p1 = scmp.ne.s32.totalorder %s2798_s16, %s2794_s15  ;;  %p3521_p3 = scmp.eq.s32.totalorder %s2960_s10, 0 }
  0x36   : > { %p157_p11 = scmp.eq.s32.totalorder %s2960_s10, 1  ;;  %p163_p0 = scmp.eq.s32.totalorder %s2303_s12, 1 }
  0x37   : > { %p2304_p2 = scmp.ge.s32.totalorder %s2814_s20, 1  ;;  %p2970_p4 = por %p3521_p3, %p58_p1 }
  0x38   : > { %p3545_p5 = scmp.ne.s32.totalorder %s2802_s17, %s2798_s16  ;;  %p2981_p8 = por %p163_p0, %p58_p1 }
  0x39   : > { %s3544_s13 = scalar_select %p2970_p4, 1, 0 }
  0x3a   : > { %p2977_p6 = por %p157_p11, %p3545_p5  ;;  %p170_p10 = scmp.lt.s32.totalorder %s2814_s20, 3 }
  0x3b   : > { %s3547_s8 = scalar_select %p2981_p8, 1, 0 }
  0x3c   : > { %s3546_s6 = scalar_select %p2977_p6, 1, 0 }
  0x3d   : > { %3548 = sst [smem:[#allocation20_spill]] %s3547_s8  ;;  %p2986_p12 = pnand %p2304_p2, %p170_p10 }
  0x3e   : > { %s2817_s22 = smov [#allocation8]   ;;  %s3004_s7 = scalar_lea.hbm %s3512_s0, %s2910_s26 }
  0x3f   : > { %s3549_s14 = scalar_select %p2986_p12, 1, 0 }
  0x40   : > { %s182_s23 = sshll.u32 %s2817_s22, 4  ;;  %p2521_p13 = pneg %p2986_p12  ;;  %s2990_s23 = int_to_ptr.vmem [resolvable:$true] %s182_s23 }
  0x41   : > { %s200_s12 = scalar_lea.vmem [#allocation2], %s2907_s25  ;;  %s2636_s21 = scalar_lea.hbm %s3515_s3, 4096 }
  0x42   : > { %p2996_p11 = pnand %p2521_p13, %p3521_p3  ;;  %s208_s24 = sshll.u32 %s200_s12, 4  ;;  %s3007_s24 = int_to_ptr.vmem [resolvable:$true] %s208_s24 }
  0x43   : > { %p2637_p1 = scmp.ne.s32.totalorder %s3515_s3, %s2636_s21  ;;  %p2643_p10 = scmp.lt.u32.totalorder %s2636_s21, %s3515_s3 }
  0x44   : > { %p2638_p0 = pneg %p2996_p11 }
  0x46   : > { %p2639_p2 = pnand %p2638_p0, %p2637_p1 }
  0x48   : > { %p2640_p5 = pneg %p2639_p2 }
  0x4a   : > { %p2645_p13 = pnand %p2643_p10, %p2640_p5 }
  0x4c   : > { %2648 = shalt.err (!%p2645_p13)
}
  0x4d   : > { %s2649_s12 = scalar_lea.vmem %s2990_s23, 4096  ;;  %p2657_p4 = scmp.lt.s32.totalorder %s2990_s23, %s2990_s23 }
  0x4e   : > { %p2650_p3 = scmp.ne.s32.totalorder %s2990_s23, %s2649_s12  ;;  %p2658_p12 = scmp.lt.s32.totalorder %s2649_s12, %s2649_s12 }
  0x50   : > { %p2652_p8 = pnand %p2650_p3, %p2638_p0  ;;  %p2659_p7 = por %p2658_p12, %p2657_p4 }
  0x52   : > { %p2653_p6 = pneg %p2652_p8 }
  0x54   : > { %p2660_p9 = pnand %p2659_p7, %p2653_p6 }
  0x56   : > { %2663 = shalt.err (!%p2660_p9)
}
  0x57   : > { %s2818_s1 = smov 1024   ;;  %s2819_s19 = smov 64  }
  0x58   : > { %2524 = dma.hbm_to_vmem [thread:$0]  (!%p2996_p11), %s3515_s3, 4096, %s2990_s23, [#allocation9], %s2818_s1, %s2818_s1, %s2819_s19  }
  0x59   : > { %s3551_s22 = sand.u32 1, %s2802_s17   ;;  %s2664_s5 = scalar_lea.hbm %s3004_s7, 128 }
  0x5a   : > { %s197_s30 = scalar_lea.sflag [#allocation3], %s3551_s22  ;;  %p2665_p7 = scmp.ne.s32.totalorder %s3004_s7, %s2664_s5 }
  0x5b   : > { %p3552_p9 = scmp.ne.s32.totalorder %s3543_s11, 0  ;;  %s2669_s8 = scalar_lea.hbm %s3512_s0, 256 }
  0x5c   : > { %p2670_p6 = scmp.lt.u32.totalorder %s3004_s7, %s3512_s0  ;;  %p2671_p8 = scmp.lt.u32.totalorder %s2669_s8, %s2664_s5 }
  0x5d   : > { %p2667_p3 = pnand %p2665_p7, %p3552_p9  ;;  %p2673_p1 = scmp.lt.u32.totalorder %s2664_s5, %s3004_s7 }
  0x5e   : > { %p2672_p12 = por %p2671_p8, %p2670_p6 }
  0x5f   : > { %p2668_p4 = pneg %p2667_p3 }
  0x60   : > { %p2674_p0 = por %p2673_p1, %p2672_p12 }
  0x62   : > { %p2675_p11 = pnand %p2674_p0, %p2668_p4 }
  0x64   : > { %2678 = shalt.err (!%p2675_p11)
}
  0x65   : > { %s2679_s23 = scalar_lea.vmem %s3007_s24, 128  ;;  %s2820_s20 = smov [#allocation2]  }
  0x66   : > { %p2680_p2 = scmp.ne.s32.totalorder %s3007_s24, %s2679_s23  ;;  %s2684_s29 = sshll.u32 %s2820_s20, 4  ;;  %s2685_s29 = int_to_ptr.vmem [resolvable:$false] %s2684_s29 }
  0x67   : > { %s2686_s4 = scalar_lea.vmem %s2685_s29, 256  ;;  %p2687_p13 = scmp.lt.s32.totalorder %s3007_s24, %s2685_s29 }
  0x68   : > { %p2682_p5 = pnand %p2680_p2, %p3552_p9  ;;  %p2688_p7 = scmp.lt.s32.totalorder %s2686_s4, %s2679_s23 }
  0x6a   : > { %p2683_p10 = pneg %p2682_p5  ;;  %p2689_p3 = por %p2688_p7, %p2687_p13 }
  0x6c   : > { %p2690_p6 = pnand %p2689_p3, %p2683_p10 }
  0x6e   : > { %2693 = shalt.err (!%p2690_p6)
}
  0x6f   : > { %p3553_p4 = scmp.ne.s32.totalorder %s3540_s27, 0  ;;  %s3057_s1 = scalar_lea.hbm %s3514_s2, %s2910_s26 }
  0x70   : > { %s237_s19 = scalar_lea.vmem [#allocation7], %s2907_s25  ;;  %s2694_s28 = scalar_lea.hbm %s3057_s1, 128 }
  0x71   : > { %2528 = dma.hbm_to_vmem [thread:$0]  (!%p3553_p4), %s3004_s7, 128, %s3007_s24, %s197_s30  }
  0x72   : > { %s244_s21 = sshll.u32 %s237_s19, 4  ;;  %p2695_p8 = scmp.ne.s32.totalorder %s3057_s1, %s2694_s28  ;;  %s245_s21 = int_to_ptr.vmem [resolvable:$true] %s244_s21 }
  0x73   : > { %s2699_s24 = scalar_lea.hbm %s3514_s2, 256  ;;  %p2700_p0 = scmp.lt.u32.totalorder %s3057_s1, %s3514_s2 }
  0x74   : > { %p2697_p12 = pnand %p2695_p8, %p3552_p9  ;;  %p2701_p11 = scmp.lt.u32.totalorder %s2699_s24, %s2694_s28 }
  0x75   : > { %p2703_p5 = scmp.lt.u32.totalorder %s2694_s28, %s3057_s1 }
  0x76   : > { %p2698_p1 = pneg %p2697_p12  ;;  %p2702_p2 = por %p2701_p11, %p2700_p0 }
  0x78   : > { %p2704_p10 = por %p2703_p5, %p2702_p2 }
  0x7a   : > { %p2705_p13 = pnand %p2704_p10, %p2698_p1 }
  0x7c   : > { %2708 = shalt.err (!%p2705_p13)
}
  0x7d   : > { %s2709_s25 = scalar_lea.vmem %s245_s21, 128  ;;  %s2821_s26 = smov [#allocation7]  }
  0x7e   : > { %p2710_p7 = scmp.ne.s32.totalorder %s245_s21, %s2709_s25  ;;  %s2714_s12 = sshll.u32 %s2821_s26, 4  ;;  %s2715_s12 = int_to_ptr.vmem [resolvable:$false] %s2714_s12 }
  0x7f   : > { %s2716_s23 = scalar_lea.vmem %s2715_s12, 256  ;;  %p2717_p8 = scmp.lt.s32.totalorder %s245_s21, %s2715_s12 }
  0x80   : > { %p2712_p3 = pnand %p2710_p7, %p3552_p9  ;;  %p2718_p12 = scmp.lt.s32.totalorder %s2716_s23, %s2709_s25 }
  0x82   : > { %p2713_p6 = pneg %p2712_p3  ;;  %p2719_p4 = por %p2718_p12, %p2717_p8 }
  0x84   : > { %p2720_p0 = pnand %p2719_p4, %p2713_p6 }
  0x86   : > { %2723 = shalt.err (!%p2720_p0)
}
  0x87   : > { %p3554_p11 = scmp.ne.s32.totalorder %s3540_s27, 0  ;;  %p3555_p1 = scmp.ne.s32.totalorder %s3549_s14, 0 }
  0x88   : > { %s3081_s11 = sand.u32 (!%p3555_p1), 1, %s2798_s16   ;;  %p3556_p9 = scmp.ne.s32.totalorder (!%p3555_p1), %s3544_s13, 0 }
  0x89   : > { %2534 = dma.hbm_to_vmem [thread:$0]  (!%p3554_p11), %s3057_s1, 128, %s245_s21, %s2929_s9  }
  0x8a   : > { %253 = sbr.rel (%p3555_p1) target bundleno = 1297 (0x511), region = 36  ;;  %s3084_s20 = sshll.u32 (!%p3555_p1), %s3081_s11, 3 }
  0x8b   : > { %s256_s29 = scalar_lea.sflag (!%p3555_p1), [#allocation3], %s3081_s11  ;;  %s259_s4 = scalar_lea.vmem (!%p3555_p1), [#allocation2], %s3084_s20 }
  0x91   : > { %2777 = dma.done.wait (%p3556_p9), %s256_s29, 128  }
  0x92   : > { %2779 = vsyncadd (%p3556_p9), %s256_s29, 4294967168  ;;  %s264_s27 = sand.u32 1, %s2960_s10   ;;  %s268_s14 = scalar_lea.vmem [#allocation5], %s3084_s20 }
  0x93   : > { %s265_s9 = scalar_lea.sflag [#allocation6], %s264_s27 }
  0x94   : > { %2781 = dma.done.wait (%p3556_p9), %s265_s9, 256  }
  0x95   : > { %2783 = vsyncadd (%p3556_p9), %s265_s9, 4294967040  ;;  %s277_s15 = scalar_lea.vmem [#allocation7], %s3084_s20  ;;  %p3557_p4 = scmp.eq.s32.totalorder %s2960_s10, 0 }
  0x97   : > { %2785 = dma.done.wait (%p3557_p4), [#allocation9], 4096   ;;  %p3558_p2 = pmov %p3557_p4 }
  0x98   : > { %v2822_v0 = vmov 0.0   ;;  %v320_v1 = vld [vmem:[#allocation8 + $0x8] sm:$0xff]  ;;  %v319_v3 = vld [vmem:[#allocation8] sm:$0xff]  ;;  %v322_v6 = vld [vmem:[#allocation8 + $0x18] sm:$0xff]  ;;  %vm351_vm0 = vcmask 261120   ;;  %s2823_s10 = smov 32   ;;  %v724_v61 = vlaneseq }
  0x99   : > { %2787 = vsyncadd (%p3558_p2), [#allocation9], 4294963200  ;;  %419 = vmatprep.mubr.f32.mxu0 %v2822_v0  ;;  %490 = vmatprep.mubr.f32.mxu1 %v2822_v0  ;;  %v328_v2 = vld [vmem:[#allocation8 + $0x48] sm:$0xff]  ;;  %v327_v5 = vld [vmem:[#allocation8 + $0x40] sm:$0xff]  ;;  %s2824_s13 = smov 96   ;;  %s2825_s8 = smov 64  }
  0x9a   : > { %v2475_v4 = vpack.c.bf16 %v328_v2, %v320_v1  ;;  %v330_v7 = vld [vmem:[#allocation8 + $0x58] sm:$0xff]  ;;  %v2477_v8 = vpack.c.bf16 %v327_v5, %v319_v3  ;;  %v336_v10 = vld [vmem:[#allocation8 + $0x88] sm:$0xff]  ;;  %v321_v12 = vld [vmem:[#allocation8 + $0x10] sm:$0xff]  ;;  %v2826_v59 = vmov 1983009808   ;;  %v725_v1 = vshrl.u32 %v724_v61, 7 }
  0x9b   : > { %v2483_v9 = vpack.c.bf16 %v330_v7, %v322_v6  ;;  %v344_v11 = vld [vmem:[#allocation8 + $0xc8] sm:$0xff]  ;;  %v329_v14 = vld [vmem:[#allocation8 + $0x50] sm:$0xff]  ;;  %v335_v15 = vld [vmem:[#allocation8 + $0x80] sm:$0xff]  ;;  %v722_v60 = vunpack.c.l.s4 %v2826_v59  ;;  %v2827_v3 = vmov 1934713408   ;;  %s2828_s1 = smov 16  }
  0x9c   : > { %2476 = vmatprep.subr.bf16.mxu0 %v2475_v4  ;;  %v2479_v13 = vpack.c.bf16 %v344_v11, %v336_v10  ;;  %v343_v16 = vld [vmem:[#allocation8 + $0xc0] sm:$0xff]  ;;  %v2485_v17 = vpack.c.bf16 %v329_v14, %v321_v12  ;;  %v338_v19 = vld [vmem:[#allocation8 + $0x98] sm:$0xff]  ;;  %v337_v22 = vld [vmem:[#allocation8 + $0x90] sm:$0xff]  ;;  %v786_v4 = vunpack.c.l.s4 %v2827_v3  ;;  %s2829_s19 = smov 8   ;;  %s2830_s21 = smov 24   ;;  %vm2139_vm1 = vcmask 64512  }
  0x9d   : > { %2478 = vmatpush1.bf16.msra.mxu0 %v2477_v8  ;;  %2484 = vmatprep.subr.bf16.mxu1 %v2483_v9  ;;  %v2481_v18 = vpack.c.bf16 %v343_v16, %v335_v15  ;;  %v346_v20 = vld [vmem:[#allocation8 + $0xd8] sm:$0xff]  ;;  %v345_v23 = vld [vmem:[#allocation8 + $0xd0] sm:$0xff]  ;;  %v324_v24 = vld [vmem:[#allocation8 + $0x28] sm:$0xff]  ;;  %s2831_s28 = smov 48   ;;  %s2832_s22 = smov 40   ;;  %vm2141_vm2 = vcmask 130048  }
  0x9e   : > { %2480 = vmatprep.subr.bf16.mxu0 %v2479_v13  ;;  %v2487_v21 = vpack.c.bf16 %v346_v20, %v338_v19  ;;  %2486 = vmatpush1.bf16.msra.mxu1 %v2485_v17  ;;  %v316_v25 = vld [vmem:[%s259_s4] sm:$0xff]  ;;  %v2489_v26 = vpack.c.bf16 %v345_v23, %v337_v22  ;;  %v332_v27 = vld [vmem:[#allocation8 + $0x68] sm:$0xff]  ;;  %v323_v28 = vld [vmem:[#allocation8 + $0x20] sm:$0xff]  ;;  %v787_v11 = vunpack.c.0.s8 %v786_v4  ;;  %s2833_s5 = smov 56   ;;  %vm2143_vm3 = vcmask 195584   ;;  %s2366_s24 = sshll.u32 %s2806_s18, 7 }
  0x9f   : > { %v331_v29 = vld [vmem:[#allocation8 + $0x60] sm:$0xff]  ;;  %v2491_v30 = vpack.c.bf16 %v332_v27, %v324_v24  ;;  %v340_v31 = vld [vmem:[#allocation8 + $0xa8] sm:$0xff]  ;;  %v326_v33 = vld [vmem:[#allocation8 + $0x38] sm:$0xff]  ;;  %vm2146_vm4 = vcmask 326656   ;;  %vm2148_vm5 = vcmask 392192   ;;  %s315_s7 = scalar_lea.vmem [#allocation10], %s3084_s20 }
  0xa0   : > { %2488 = vmatprep.subr.bf16.mxu1 %v2487_v21  ;;  %v348_v32 = vld [vmem:[#allocation8 + $0xe8] sm:$0xff]  ;;  %v2493_v34 = vpack.c.bf16 %v331_v29, %v323_v28  ;;  %v334_v35 = vld [vmem:[#allocation8 + $0x78] sm:$0xff]  ;;  %v339_v36 = vld [vmem:[#allocation8 + $0xa0] sm:$0xff]  ;;  %s2169_s30 = sshll.u32 %s315_s7, 4  ;;  %vm2150_vm6 = vcmask 457728   ;;  %vm2152_vm7 = vcmask 523264   ;;  %s3465_s30 = int_to_ptr.vmem [resolvable:$true] %s2169_s30 }
  0xa1   : > { %2482 = vmatpush1.bf16.msra.mxu0 %v2481_v18  ;;  %v347_v37 = vld [vmem:[#allocation8 + $0xe0] sm:$0xff]  ;;  %v2495_v38 = vpack.c.bf16 %v348_v32, %v340_v31  ;;  %v2499_v39 = vpack.c.bf16 %v334_v35, %v326_v33  ;;  %v325_v40 = vld [vmem:[#allocation8 + $0x30] sm:$0xff]  ;;  %v342_v42 = vld [vmem:[#allocation8 + $0xb8] sm:$0xff]  ;;  %v3184_v18 = vsub.s32 %v787_v11, %v725_v1  ;;  %s3559_s12 = sld [smem:[#allocation22_spill]]  ;;  %s2155_s29 = scalar_lea.sflag [#allocation4], %s3081_s11 }
  0xa2   : > { %2492 = vmatprep.subr.bf16.mxu0 %v2491_v30  ;;  %v333_v41 = vld [vmem:[#allocation8 + $0x70] sm:$0xff]  ;;  %2490 = vmatpush1.bf16.msra.mxu1 %v2489_v26  ;;  %v350_v44 = vld [vmem:[#allocation8 + $0xf8] sm:$0xff]  ;;  %v2497_v48 = vpack.c.bf16 %v347_v37, %v339_v36  ;;  %v317_v58 = vld [vmem:[%s268_s14] sm:$0xff]  ;;  %s2724_s18 = scalar_lea.vmem %s3465_s30, 128  ;;  %p3560_p10 = scmp.ne.s32.totalorder %s3546_s6, 0 }
  0xa3   : > { %v2501_v43 = vpack.c.bf16 %v333_v41, %v325_v40  ;;  %2500 = vmatprep.subr.bf16.mxu1 %v2499_v39  ;;  %v2503_v45 = vpack.c.bf16 %v350_v44, %v342_v42  ;;  %v341_v46 = vld [vmem:[#allocation8 + $0xb0] sm:$0xff]  ;;  %p2725_p5 = scmp.ne.s32.totalorder %s3465_s30, %s2724_s18  ;;  %s2834_s20 = smov [#allocation10]  }
  0xa4   : > { %2319 = vmatmul.mubr.msk.f32.vlgmr.msra.gmra.mrb[0].mxu0 %vm351_vm0, %v316_v25  ;;  %v349_v47 = vld [vmem:[#allocation8 + $0xf0] sm:$0xff]  ;;  %s2728_s4 = sshll.u32 %s2834_s20, 4  ;;  %s2729_s4 = int_to_ptr.vmem [resolvable:$false] %s2728_s4 }
  0xa5   : > { %2494 = vmatpush1.bf16.msra.mxu0 %v2493_v34  ;;  %561 = vmatprep.mubr.f32.mxu0 %v2822_v0  ;;  %v2505_v49 = vpack.c.bf16 %v349_v47, %v341_v46  ;;  %p2726_p13 = pnand %p2725_p5, %p3560_p10  ;;  %s2730_s27 = scalar_lea.vmem %s2729_s4, 256 }
  0xa6   : > { %2320 = vmatmul.mubr.msk.f32.vlgmr.msra.gmra.mrb[0].mxu1 %vm351_vm0, %v316_v25  ;;  %2496 = vmatprep.subr.bf16.mxu0 %v2495_v38  ;;  %p2731_p3 = scmp.lt.s32.totalorder %s3465_s30, %s2729_s4  ;;  %p2732_p6 = scmp.lt.s32.totalorder %s2730_s27, %s2724_s18 }
  0xa7   : > { %2502 = vmatpush1.bf16.msra.mxu1 %v2501_v43  ;;  %632 = vmatprep.mubr.f32.mxu1 %v2822_v0  ;;  %v723_v0 = vunpack.c.0.s8 %v722_v60  ;;  %s3463_s23 = scalar_lea.hbm %s3559_s12, %s2366_s24  ;;  %p2727_p7 = pneg %p2726_p13 }
  0xa8   : > { %2504 = vmatprep.subr.bf16.mxu1 %v2503_v45  ;;  %p2733_p8 = por %p2732_p6, %p2731_p3 }
  0xa9   : > { %2498 = vmatpush1.bf16.msra.mxu0 %v2497_v48  ;;  %v3178_v7 = vsub.s32 %v723_v0, %v725_v1 }
  0xaa   : > { %2411 = vmatprep.subr.msk.mxu0 %vm351_vm0, %v317_v58  ;;  %p2734_p12 = pnand %p2733_p8, %p2727_p7 }
  0xab   : > { %2506 = vmatpush1.bf16.msra.mxu1 %v2505_v49 }
  0xac   : > { %2321 = vmatmul.mubr.msk.f32.vlgmr.msra.gmra.mrb[2].mxu0 %vm351_vm0, %v316_v25  ;;  %2507 = vmatprep.subr.msk.mxu1 %vm351_vm0, %v317_v58 }
  0xae   : > { %2322 = vmatmul.mubr.msk.f32.vlgmr.msra.gmra.mrb[2].mxu1 %vm351_vm0, %v316_v25 }
  0xb2   : > { %2412 = vmatpush3.xpose.msk.msra.mxu0 %vm351_vm0, %v317_v58 }
  0xb4   : > { %2508 = vmatpush3.xpose.msk.msra.mxu1 %vm351_vm0, %v317_v58 }
 0x177   : > { %v421_v50 = vpop.f32.mrb[0].mxu0 }
 0x178   : > { %646 = vrot.lane.b32.xlu1 %v421_v50, %s2823_s10  ;;  %640 = vrot.lane.b32.xlu0 %v421_v50, %s2824_s13  ;;  %v3115_v51 = vpop.f32.mrb[1].mxu0 }
 0x179   : > { %v3117_v52 = vpop.f32.mrb[0].mxu1 }
 0x17a   : > { %v3119_v53 = vpop.f32.mrb[1].mxu1 }
 0x17c   : > { %663 = vrot.lane.b32.xlu1 %v3117_v52, %s2825_s8  ;;  %643 = vrot.lane.b32.xlu0 %v421_v50, %s2825_s8 }
 0x17f   : > { %v3124_v54 = vpop.f32.mrb[2].mxu0 }
 0x180   : > { %660 = vrot.lane.b32.xlu0 %v3117_v52, %s2824_s13  ;;  %650 = vrot.lane.b32.xlu1 %v3115_v51, %s2824_s13  ;;  %v3130_v55 = vpop.f32.mrb[3].mxu0 }
 0x181   : > { %v3132_v56 = vpop.f32.mrb[2].mxu1 }
 0x182   : > { %v3134_v57 = vpop.f32.mrb[3].mxu1 }
 0x184   : > { %666 = vrot.lane.b32.xlu0 %v3117_v52, %s2823_s10  ;;  %656 = vrot.lane.b32.xlu1 %v3115_v51, %s2823_s10 }
 0x188   : > { %653 = vrot.lane.b32.xlu0 %v3115_v51, %s2825_s8  ;;  %670 = vrot.lane.b32.xlu1 %v3119_v53, %s2824_s13 }
 0x18c   : > { %673 = vrot.lane.b32.xlu0 %v3119_v53, %s2825_s8  ;;  %676 = vrot.lane.b32.xlu1 %v3119_v53, %s2823_s10 }
 0x190   : > { %683 = vrot.lane.b32.xlu1 %v3124_v54, %s2825_s8  ;;  %680 = vrot.lane.b32.xlu0 %v3124_v54, %s2824_s13 }
 0x194   : > { %703 = vrot.lane.b32.xlu1 %v3132_v56, %s2825_s8  ;;  %686 = vrot.lane.b32.xlu0 %v3124_v54, %s2823_s10 }
 0x198   : > { %700 = vrot.lane.b32.xlu0 %v3132_v56, %s2824_s13  ;;  %690 = vrot.lane.b32.xlu1 %v3130_v55, %s2824_s13 }
 0x19c   : > { %706 = vrot.lane.b32.xlu0 %v3132_v56, %s2823_s10  ;;  %696 = vrot.lane.b32.xlu1 %v3130_v55, %s2823_s10 }
 0x1a0   : > { %693 = vrot.lane.b32.xlu0 %v3130_v55, %s2825_s8  ;;  %710 = vrot.lane.b32.xlu1 %v3134_v57, %s2824_s13 }
 0x1a4   : > { %713 = vrot.lane.b32.xlu0 %v3134_v57, %s2825_s8  ;;  %716 = vrot.lane.b32.xlu1 %v3134_v57, %s2823_s10 }
 0x1ea   : > { %v647_v62 = vpop.permute.xlu1 %646  ;;  %v641_v63 = vpop.permute.xlu0 %640 }
 0x1eb   : > { %v735_v8 = vcombine.low %v641_v63, %v647_v62  ;;  %v736_v10 = vcombine.high %v641_v63, %v647_v62 }
 0x1ed   : > { %v743_v15 = vrot.slane %v735_v8, %v3178_v7  ;;  %v750_v17 = vrot.slane %v736_v10, %v3178_v7 }
 0x1ee   : > { %v664_v2 = vpop.permute.xlu1 %663  ;;  %v644_v5 = vpop.permute.xlu0 %643 }
 0x1ef   : > { %v719_v6 = vcombine.low %v421_v50, %v644_v5  ;;  %v720_v9 = vcombine.high %v421_v50, %v644_v5  ;;  %v855_v21 = vcombine.low %v3117_v52, %v664_v2  ;;  %v856_v22 = vcombine.high %v3117_v52, %v664_v2 }
 0x1f1   : > { %v727_v14 = vrot.slane %v719_v6, %v3178_v7  ;;  %v734_v16 = vrot.slane %v720_v9, %v3178_v7  ;;  %v3192_v34 = vrot.slane %v855_v21, %v3178_v7  ;;  %v870_v35 = vrot.slane %v856_v22, %v3178_v7 }
 0x1f2   : > { %v661_v12 = vpop.permute.xlu0 %660  ;;  %v651_v13 = vpop.permute.xlu1 %650 }
 0x1f3   : > { %v783_v23 = vcombine.low %v727_v14, %v743_v15  ;;  %v784_v25 = vcombine.high %v727_v14, %v743_v15  ;;  %v799_v27 = vcombine.low %v734_v16, %v750_v17  ;;  %v800_v28 = vcombine.high %v734_v16, %v750_v17 }
 0x1f5   : > { %v3196_v36 = vrot.slane %v783_v23, %v3184_v18  ;;  %v3199_v37 = vrot.slane %v784_v25, %v3184_v18  ;;  %v3205_v41 = vrot.slane %v799_v27, %v3184_v18  ;;  %v3208_v42 = vrot.slane %v800_v28, %v3184_v18 }
 0x1f6   : > { %v667_v19 = vpop.permute.xlu0 %666  ;;  %v657_v20 = vpop.permute.xlu1 %656 }
 0x1f7   : > { %v871_v24 = vcombine.low %v661_v12, %v667_v19  ;;  %v872_v26 = vcombine.high %v661_v12, %v667_v19  ;;  %v767_v29 = vcombine.low %v651_v13, %v657_v20  ;;  %v768_v30 = vcombine.high %v651_v13, %v657_v20 }
 0x1f9   : > { %v3189_v31 = vrot.slane %v871_v24, %v3178_v7  ;;  %v886_v38 = vrot.slane %v872_v26, %v3178_v7  ;;  %v775_v43 = vrot.slane %v767_v29, %v3178_v7  ;;  %v782_v44 = vrot.slane %v768_v30, %v3178_v7 }
 0x1fa   : > { %v654_v32 = vpop.permute.xlu0 %653  ;;  %v671_v33 = vpop.permute.xlu1 %670 }
 0x1fb   : > { %v751_v39 = vcombine.low %v3115_v51, %v654_v32  ;;  %v752_v40 = vcombine.high %v3115_v51, %v654_v32  ;;  %v919_v45 = vcombine.low %v3192_v34, %v3189_v31  ;;  %v920_v46 = vcombine.high %v3192_v34, %v3189_v31 }
 0x1fc   : > { %v935_v60 = vcombine.low %v870_v35, %v886_v38  ;;  %v936_v4 = vcombine.high %v870_v35, %v886_v38 }
 0x1fd   : > { %v759_v47 = vrot.slane %v751_v39, %v3178_v7  ;;  %v766_v48 = vrot.slane %v752_v40, %v3178_v7  ;;  %v3231_v14 = vrot.slane %v919_v45, %v3184_v18  ;;  %v3275_v38 = vrot.slane %v920_v46, %v3184_v18 }
 0x1fe   : > { %v674_v49 = vpop.permute.xlu0 %673  ;;  %v677_v50 = vpop.permute.xlu1 %676  ;;  %v3241_v19 = vrot.slane %v935_v60, %v3184_v18  ;;  %v3253_v23 = vrot.slane %v936_v4, %v3184_v18 }
 0x1ff   : > { %v887_v51 = vcombine.low %v3119_v53, %v674_v49  ;;  %v888_v52 = vcombine.high %v3119_v53, %v674_v49  ;;  %v903_v58 = vcombine.low %v671_v33, %v677_v50  ;;  %v904_v59 = vcombine.high %v671_v33, %v677_v50 }
 0x200   : > { %v815_v61 = vcombine.low %v759_v47, %v775_v43  ;;  %v831_v62 = vcombine.low %v766_v48, %v782_v44  ;;  %v832_v63 = vcombine.high %v766_v48, %v782_v44  ;;  %v816_v5 = vcombine.high %v759_v47, %v775_v43 }
 0x201   : > { %v895_v0 = vrot.slane %v887_v51, %v3178_v7  ;;  %v902_v1 = vrot.slane %v888_v52, %v3178_v7  ;;  %v911_v2 = vrot.slane %v903_v58, %v3178_v7  ;;  %v918_v3 = vrot.slane %v904_v59, %v3178_v7 }
 0x202   : > { %v3225_v6 = vrot.slane %v815_v61, %v3184_v18  ;;  %v3228_v53 = vrot.slane %v831_v62, %v3184_v18  ;;  %v684_v8 = vpop.permute.xlu1 %683  ;;  %v681_v9 = vpop.permute.xlu0 %680  ;;  %v3234_v15 = vrot.slane %v832_v63, %v3184_v18  ;;  %v3256_v24 = vrot.slane %v816_v5, %v3184_v18 }
 0x203   : > { %v951_v10 = vcombine.low %v895_v0, %v911_v2  ;;  %v952_v11 = vcombine.high %v895_v0, %v911_v2  ;;  %v967_v12 = vcombine.low %v902_v1, %v918_v3  ;;  %v968_v13 = vcombine.high %v902_v1, %v918_v3 }
 0x204   : > { %v847_v16 = vcombine.low %v3196_v36, %v3225_v6  ;;  %v852_v17 = vcombine.high %v3205_v41, %v3228_v53  ;;  %v848_v27 = vcombine.high %v3196_v36, %v3225_v6  ;;  %v991_v31 = vcombine.low %v3124_v54, %v684_v8  ;;  %v318_v36 = vld [vmem:[%s277_s15] sm:$0xff] }
 0x205   : > { %v3244_v20 = vrot.slane %v951_v10, %v3184_v18  ;;  %v3247_v21 = vrot.slane %v967_v12, %v3184_v18  ;;  %v3250_v22 = vrot.slane %v968_v13, %v3184_v18  ;;  %v3263_v28 = vrot.slane %v952_v11, %v3184_v18  ;;  %2461 = vmatprep.subr.msk.mxu1 %vm351_vm0, %v318_v36 }
 0x206   : > { %2413 = vmatprep.mubr.msk.f32.mxu0 %vm351_vm0, %v847_v16  ;;  %2443 = vmatprep.mubr.msk.f32.mxu1 %vm351_vm0, %v852_v17  ;;  %v704_v25 = vpop.permute.xlu1 %703  ;;  %v687_v26 = vpop.permute.xlu0 %686  ;;  %v853_v34 = vcombine.low %v3208_v42, %v3234_v15  ;;  %v992_v40 = vcombine.high %v3124_v54, %v684_v8  ;;  %v849_v47 = vcombine.low %v3199_v37, %v3256_v24 }
 0x207   : > { %v983_v29 = vcombine.low %v3231_v14, %v3244_v20  ;;  %v988_v30 = vcombine.high %v3241_v19, %v3247_v21  ;;  %v1007_v32 = vcombine.low %v681_v9, %v687_v26  ;;  %v1008_v33 = vcombine.high %v681_v9, %v687_v26 }
 0x208   : > { %v984_v35 = vcombine.high %v3231_v14, %v3244_v20  ;;  %v989_v39 = vcombine.low %v3253_v23, %v3250_v22  ;;  %v854_v46 = vcombine.high %v3208_v42, %v3234_v15  ;;  %v985_v48 = vcombine.low %v3275_v38, %v3263_v28 }
 0x209   : > { %2414 = vmatmul.mubr.msk.f32.vlgmr.msra.gmra.mrb[4].mxu0 %vm351_vm0, %v983_v29  ;;  %2444 = vmatmul.mubr.msk.f32.vlgmr.msra.gmra.mrb[4].mxu1 %vm351_vm0, %v988_v30  ;;  %v1015_v43 = vrot.slane %v1007_v32, %v3178_v7  ;;  %v990_v49 = vcombine.high %v3253_v23, %v3250_v22  ;;  %v850_v50 = vcombine.high %v3199_v37, %v3256_v24 }
 0x20a   : > { %v701_v44 = vpop.permute.xlu0 %700  ;;  %v691_v45 = vpop.permute.xlu1 %690  ;;  %v986_v54 = vcombine.high %v3275_v38, %v3263_v28  ;;  %v999_v51 = vrot.slane %v991_v31, %v3178_v7  ;;  %v1127_v52 = vcombine.low %v3132_v56, %v704_v25  ;;  %v1128_v58 = vcombine.high %v3132_v56, %v704_v25  ;;  %2462 = vmatpush3.xpose.msk.msra.mxu1 %vm351_vm0, %v318_v36 }
 0x20b   : > { %v1022_v59 = vrot.slane %v1008_v33, %v3178_v7  ;;  %v851_v60 = vcombine.low %v3205_v41, %v3228_v53  ;;  %v987_v61 = vcombine.low %v3241_v19, %v3247_v21  ;;  %v1006_v62 = vrot.slane %v992_v40, %v3178_v7 }
 0x20c   : > { %v1055_v63 = vcombine.low %v999_v51, %v1015_v43  ;;  %v1056_v0 = vcombine.high %v999_v51, %v1015_v43  ;;  %v1135_v5 = vrot.slane %v1127_v52, %v3178_v7  ;;  %v1142_v56 = vrot.slane %v1128_v58, %v3178_v7 }
 0x20d   : > { %v1071_v8 = vcombine.low %v1006_v62, %v1022_v59  ;;  %v1072_v9 = vcombine.high %v1006_v62, %v1022_v59 }
 0x20e   : > { %v707_v1 = vpop.permute.xlu0 %706  ;;  %v697_v2 = vpop.permute.xlu1 %696  ;;  %v3309_v16 = vrot.slane %v1055_v63, %v3184_v18  ;;  %v3312_v17 = vrot.slane %v1056_v0, %v3184_v18 }
 0x20f   : > { %v1143_v3 = vcombine.low %v701_v44, %v707_v1  ;;  %v1144_v4 = vcombine.high %v701_v44, %v707_v1  ;;  %v1039_v12 = vcombine.low %v691_v45, %v697_v2  ;;  %v1040_v13 = vcombine.high %v691_v45, %v697_v2 }
 0x210   : > { %v3315_v33 = vrot.slane %v1071_v8, %v3184_v18  ;;  %v3318_v40 = vrot.slane %v1072_v9, %v3184_v18 }
 0x211   : > { %v1151_v10 = vrot.slane %v1143_v3, %v3178_v7  ;;  %v1158_v11 = vrot.slane %v1144_v4, %v3178_v7  ;;  %v1047_v52 = vrot.slane %v1039_v12, %v3178_v7  ;;  %v1054_v58 = vrot.slane %v1040_v13, %v3178_v7 }
 0x212   : > { %v694_v25 = vpop.permute.xlu0 %693  ;;  %v711_v26 = vpop.permute.xlu1 %710 }
 0x213   : > { %v1191_v29 = vcombine.low %v1135_v5, %v1151_v10  ;;  %v1192_v30 = vcombine.high %v1135_v5, %v1151_v10  ;;  %v1207_v31 = vcombine.low %v1142_v56, %v1158_v11  ;;  %v1208_v32 = vcombine.high %v1142_v56, %v1158_v11 }
 0x214   : > { %v1023_v43 = vcombine.low %v3130_v55, %v694_v25  ;;  %v1024_v44 = vcombine.high %v3130_v55, %v694_v25 }
 0x215   : > { %v1199_v45 = vrot.slane %v1191_v29, %v3184_v18  ;;  %v3324_v51 = vrot.slane %v1192_v30, %v3184_v18  ;;  %v3329_v59 = vrot.slane %v1207_v31, %v3184_v18  ;;  %v3332_v62 = vrot.slane %v1208_v32, %v3184_v18 }
 0x216   : > { %v1031_v63 = vrot.slane %v1023_v43, %v3178_v7  ;;  %v1038_v0 = vrot.slane %v1024_v44, %v3178_v7  ;;  %v714_v55 = vpop.permute.xlu0 %713  ;;  %v717_v1 = vpop.permute.xlu1 %716 }
 0x217   : > { %v1159_v2 = vcombine.low %v3134_v57, %v714_v55  ;;  %v1160_v3 = vcombine.high %v3134_v57, %v714_v55  ;;  %v1175_v4 = vcombine.low %v711_v26, %v717_v1  ;;  %v1176_v5 = vcombine.high %v711_v26, %v717_v1 }
 0x218   : > { %v1087_v56 = vcombine.low %v1031_v63, %v1047_v52  ;;  %v1088_v8 = vcombine.high %v1031_v63, %v1047_v52  ;;  %v1103_v9 = vcombine.low %v1038_v0, %v1054_v58  ;;  %v1104_v10 = vcombine.high %v1038_v0, %v1054_v58 }
 0x219   : > { %v1167_v11 = vrot.slane %v1159_v2, %v3178_v7  ;;  %v1174_v12 = vrot.slane %v1160_v3, %v3178_v7  ;;  %v1183_v13 = vrot.slane %v1175_v4, %v3178_v7  ;;  %v1190_v25 = vrot.slane %v1176_v5, %v3178_v7 }
 0x21a   : > { %v1095_v29 = vrot.slane %v1087_v56, %v3184_v18  ;;  %v1102_v30 = vrot.slane %v1088_v8, %v3184_v18  ;;  %v1111_v57 = vrot.slane %v1103_v9, %v3184_v18  ;;  %v1118_v26 = vrot.slane %v1104_v10, %v3184_v18 }
 0x21b   : > { %v1223_v31 = vcombine.low %v1167_v11, %v1183_v13  ;;  %v1224_v32 = vcombine.high %v1167_v11, %v1183_v13  ;;  %v1239_v43 = vcombine.low %v1174_v12, %v1190_v25  ;;  %v1240_v44 = vcombine.high %v1174_v12, %v1190_v25 }
 0x21c   : > { %v1119_v52 = vcombine.low %v3309_v16, %v1095_v29  ;;  %v1124_v58 = vcombine.high %v3315_v33, %v1111_v57  ;;  %v1120_v63 = vcombine.high %v3309_v16, %v1095_v29  ;;  %v1125_v0 = vcombine.low %v3318_v40, %v1118_v26 }
 0x21d   : > { %v1231_v55 = vrot.slane %v1223_v31, %v3184_v18  ;;  %v1238_v1 = vrot.slane %v1224_v32, %v3184_v18  ;;  %v1247_v2 = vrot.slane %v1239_v43, %v3184_v18  ;;  %v1254_v3 = vrot.slane %v1240_v44, %v3184_v18 }
 0x21e   : > { %2416 = vmatprep.mubr.msk.f32.mxu0 %vm351_vm0, %v1119_v52  ;;  %2446 = vmatprep.mubr.msk.f32.mxu1 %vm351_vm0, %v1124_v58  ;;  %v1121_v4 = vcombine.low %v3312_v17, %v1102_v30  ;;  %v1126_v5 = vcombine.high %v3318_v40, %v1118_v26  ;;  %v1122_v16 = vcombine.high %v3312_v17, %v1102_v30 }
 0x21f   : > { %v1255_v56 = vcombine.low %v1199_v45, %v1231_v55  ;;  %v1260_v8 = vcombine.high %v3329_v59, %v1247_v2  ;;  %v1256_v9 = vcombine.high %v1199_v45, %v1231_v55  ;;  %v1261_v10 = vcombine.low %v3332_v62, %v1254_v3 }
 0x220   : > { %v1257_v11 = vcombine.low %v3324_v51, %v1238_v1  ;;  %v1262_v12 = vcombine.high %v3332_v62, %v1254_v3  ;;  %v1258_v13 = vcombine.high %v3324_v51, %v1238_v1  ;;  %v1123_v25 = vcombine.low %v3315_v33, %v1111_v57 }
 0x221   : > { %2417 = vmatmul.mubr.msk.f32.gmra.mrb[6].mxu0 %vm351_vm0, %v1255_v56  ;;  %2447 = vmatmul.mubr.msk.f32.gmra.mrb[6].mxu1 %vm351_vm0, %v1260_v8  ;;  %v1259_v17 = vcombine.low %v3329_v59, %v1247_v2 }
 0x222   : > { %2419 = vmatprep.mubr.msk.f32.mxu0 %vm351_vm0, %v848_v27  ;;  %2449 = vmatprep.mubr.msk.f32.mxu1 %vm351_vm0, %v853_v34 }
 0x225   : > { %2420 = vmatmul.mubr.msk.f32.gmra.mrb[8].mxu0 %vm351_vm0, %v984_v35  ;;  %2450 = vmatmul.mubr.msk.f32.gmra.mrb[8].mxu1 %vm351_vm0, %v989_v39 }
 0x226   : > { %2422 = vmatprep.mubr.msk.f32.mxu0 %vm351_vm0, %v1120_v63  ;;  %2452 = vmatprep.mubr.msk.f32.mxu1 %vm351_vm0, %v1125_v0 }
 0x229   : > { %2423 = vmatmul.mubr.msk.f32.gmra.mrb[10].mxu0 %vm351_vm0, %v1256_v9  ;;  %2453 = vmatmul.mubr.msk.f32.gmra.mrb[10].mxu1 %vm351_vm0, %v1261_v10 }
 0x22a   : > { %2425 = vmatprep.mubr.msk.f32.mxu0 %vm351_vm0, %v849_v47  ;;  %2455 = vmatprep.mubr.msk.f32.mxu1 %vm351_vm0, %v854_v46 }
 0x22d   : > { %2426 = vmatmul.mubr.msk.f32.gmra.mrb[12].mxu0 %vm351_vm0, %v985_v48  ;;  %2456 = vmatmul.mubr.msk.f32.gmra.mrb[12].mxu1 %vm351_vm0, %v990_v49 }
 0x22e   : > { %2428 = vmatprep.mubr.msk.f32.mxu0 %vm351_vm0, %v1121_v4  ;;  %2458 = vmatprep.mubr.msk.f32.mxu1 %vm351_vm0, %v1126_v5 }
 0x231   : > { %2429 = vmatmul.mubr.msk.f32.gmra.mrb[14].mxu0 %vm351_vm0, %v1257_v11  ;;  %2459 = vmatmul.mubr.msk.f32.gmra.mrb[14].mxu1 %vm351_vm0, %v1262_v12 }
 0x232   : > { %2431 = vmatprep.mubr.msk.f32.mxu0 %vm351_vm0, %v850_v50 }
 0x235   : > { %2432 = vmatmul.mubr.msk.f32.gmra.mrb[16].mxu0 %vm351_vm0, %v986_v54 }
 0x236   : > { %2434 = vmatprep.mubr.msk.f32.mxu0 %vm351_vm0, %v1122_v16 }
 0x239   : > { %2435 = vmatmul.mubr.msk.f32.gmra.mrb[18].mxu0 %vm351_vm0, %v1258_v13 }
 0x23a   : > { %2437 = vmatprep.mubr.msk.f32.mxu0 %vm351_vm0, %v851_v60 }
 0x23d   : > { %2438 = vmatmul.mubr.msk.f32.gmra.mrb[20].mxu0 %vm351_vm0, %v987_v61 }
 0x23e   : > { %2440 = vmatprep.mubr.msk.f32.mxu0 %vm351_vm0, %v1123_v25 }
 0x241   : > { %2441 = vmatmul.mubr.msk.f32.gmra.mrb[22].mxu0 %vm351_vm0, %v1259_v17 }
 0x2dc   : > { %v2415_v37 = vpop.f32.mrb[4].mxu0  ;;  %v2445_v42 = vpop.f32.mrb[4].mxu1 }
 0x2dd   : > { %v1428_v41 = vpop.f32.mrb[5].mxu0  ;;  %v1528_v6 = vpop.f32.mrb[5].mxu1 }
 0x2de   : > { %1747 = vxpose.xlu1.b32.start [1/4] (short) (narrow) %v1528_v6, 8  ;;  %1587 = vxpose.xlu0.b32.start [1/4] (short) (narrow) %v1428_v41, 8 }
 0x2e2   : > { %1748 = vxpose.xlu1.b32.cont [2/4] (short) (narrow) %v2445_v42, 8  ;;  %1588 = vxpose.xlu0.b32.cont [2/4] (short) (narrow) %v2415_v37, 8 }
 0x2f4   : > { %v2418_v53 = vpop.f32.mrb[6].mxu0  ;;  %v2448_v14 = vpop.f32.mrb[6].mxu1 }
 0x2f5   : > { %v1438_v15 = vpop.f32.mrb[7].mxu0  ;;  %v1538_v19 = vpop.f32.mrb[7].mxu1 }
 0x2f6   : > { %1749 = vxpose.xlu1.b32.cont [3/4] (short) (narrow) %v1538_v19, 8  ;;  %1589 = vxpose.xlu0.b32.cont [3/4] (short) (narrow) %v1438_v15, 8 }
 0x2f8   : > { %v2421_v20 = vpop.f32.mrb[8].mxu0  ;;  %v2451_v21 = vpop.f32.mrb[8].mxu1 }
 0x2f9   : > { %v1448_v22 = vpop.f32.mrb[9].mxu0  ;;  %v1548_v23 = vpop.f32.mrb[9].mxu1 }
 0x2fa   : > { %1750 = vxpose.xlu1.b32.end [4/4] (short) (narrow) %v2448_v14, 8  ;;  %1590 = vxpose.xlu0.b32.end [4/4] (short) (narrow) %v2418_v53, 8 }
 0x2fc   : > { %v2424_v24 = vpop.f32.mrb[10].mxu0  ;;  %v2454_v27 = vpop.f32.mrb[10].mxu1 }
 0x2fd   : > { %v1458_v28 = vpop.f32.mrb[11].mxu0  ;;  %v1558_v34 = vpop.f32.mrb[11].mxu1 }
 0x2fe   : > { %1619 = vxpose.xlu1.b32.start [1/4] (short) (narrow) %v1448_v22, 8 }
 0x300   : > { %v2427_v35 = vpop.f32.mrb[12].mxu0  ;;  %v2457_v38 = vpop.f32.mrb[12].mxu1 }
 0x301   : > { %v1468_v39 = vpop.f32.mrb[13].mxu0  ;;  %v1568_v47 = vpop.f32.mrb[13].mxu1 }
 0x302   : > { %1620 = vxpose.xlu1.b32.cont [2/4] (short) (narrow) %v2421_v20, 8  ;;  %1651 = vxpose.xlu0.b32.start [1/4] (short) (narrow) %v1468_v39, 8 }
 0x304   : > { %v2430_v46 = vpop.f32.mrb[14].mxu0  ;;  %v2460_v48 = vpop.f32.mrb[14].mxu1 }
 0x305   : > { %v1478_v49 = vpop.f32.mrb[15].mxu0  ;;  %v1578_v50 = vpop.f32.mrb[15].mxu1 }
 0x306   : > { %1621 = vxpose.xlu1.b32.cont [3/4] (short) (narrow) %v1458_v28, 8  ;;  %1652 = vxpose.xlu0.b32.cont [2/4] (short) (narrow) %v2427_v35, 8 }
 0x308   : > { %v2433_v54 = vpop.f32.mrb[16].mxu0 }
 0x309   : > { %v1488_v60 = vpop.f32.mrb[17].mxu0 }
 0x30a   : > { %1622 = vxpose.xlu1.b32.end [4/4] (short) (narrow) %v2424_v24, 8  ;;  %1653 = vxpose.xlu0.b32.cont [3/4] (short) (narrow) %v1478_v49, 8 }
 0x30c   : > { %v2436_v61 = vpop.f32.mrb[18].mxu0 }
 0x30d   : > { %v1498_v33 = vpop.f32.mrb[19].mxu0 }
 0x30e   : > { %1654 = vxpose.xlu0.b32.end [4/4] (short) (narrow) %v2430_v46, 8  ;;  %1683 = vxpose.xlu1.b32.start [1/4] (short) (narrow) %v1488_v60, 8 }
 0x310   : > { %v2439_v40 = vpop.f32.mrb[20].mxu0 }
 0x311   : > { %v1508_v45 = vpop.f32.mrb[21].mxu0 }
 0x312   : > { %1684 = vxpose.xlu1.b32.cont [2/4] (short) (narrow) %v2433_v54, 8  ;;  %1715 = vxpose.xlu0.b32.start [1/4] (short) (narrow) %v1508_v45, 8 }
 0x314   : > { %v2442_v51 = vpop.f32.mrb[22].mxu0 }
 0x315   : > { %v1518_v59 = vpop.f32.mrb[23].mxu0 }
 0x316   : > { %1685 = vxpose.xlu1.b32.cont [3/4] (short) (narrow) %v1498_v33, 8  ;;  %1716 = vxpose.xlu0.b32.cont [2/4] (short) (narrow) %v2439_v40, 8 }
 0x31a   : > { %1686 = vxpose.xlu1.b32.end [4/4] (short) (narrow) %v2436_v61, 8  ;;  %1717 = vxpose.xlu0.b32.cont [3/4] (short) (narrow) %v1518_v59, 8 }
 0x31e   : > { %1811 = vxpose.xlu1.b32.start [1/4] (short) (narrow) %v1568_v47, 8  ;;  %1718 = vxpose.xlu0.b32.end [4/4] (short) (narrow) %v2442_v51, 8 }
 0x322   : > { %1812 = vxpose.xlu1.b32.cont [2/4] (short) (narrow) %v2457_v38, 8  ;;  %1779 = vxpose.xlu0.b32.start [1/4] (short) (narrow) %v1548_v23, 8 }
 0x326   : > { %1813 = vxpose.xlu1.b32.cont [3/4] (short) (narrow) %v1578_v50, 8  ;;  %1780 = vxpose.xlu0.b32.cont [2/4] (short) (narrow) %v2451_v21, 8 }
 0x32a   : > { %1814 = vxpose.xlu1.b32.end [4/4] (short) (narrow) %v2460_v48, 8  ;;  %1781 = vxpose.xlu0.b32.cont [3/4] (short) (narrow) %v1558_v34, 8 }
 0x32e   : > { %1782 = vxpose.xlu0.b32.end [4/4] (short) (narrow) %v2454_v27, 8 }
 0x36e   : > { %v1603_v62 = vpop.trf.xlu0  ;;  %v1763_v29 = vpop.trf.xlu1 }
 0x36f   : > { %2463 = vmatprep.mubr.msk.f32.mxu1 %vm351_vm0, %v1603_v62 }
 0x37e   : > { %v1635_v30 = vpop.trf.xlu1 }
 0x37f   : > { %2464 = vmatmul.mubr.msk.f32.vlgmr.msra.gmra.mrb[16].mxu1 %vm351_vm0, %v1635_v30 }
 0x382   : > { %v1667_v57 = vpop.trf.xlu0 }
 0x383   : > { %2466 = vmatprep.mubr.msk.f32.mxu1 %vm351_vm0, %v1667_v57 }
 0x38e   : > { %v1699_v26 = vpop.trf.xlu1 }
 0x38f   : > { %2467 = vmatmul.mubr.msk.f32.gmra.mrb[18].mxu1 %vm351_vm0, %v1699_v26 }
 0x392   : > { %v1731_v31 = vpop.trf.xlu0 }
 0x393   : > { %2469 = vmatprep.mubr.msk.f32.mxu1 %vm351_vm0, %v1731_v31 }
 0x394   : > { %2470 = vmatmul.mubr.msk.f32.gmra.mrb[20].mxu1 %vm351_vm0, %v1763_v29 }
 0x39e   : > { %v1827_v32 = vpop.trf.xlu1 }
 0x3a2   : > { %v1795_v43 = vpop.trf.xlu0 }
 0x3a3   : > { %2472 = vmatprep.mubr.msk.f32.mxu1 %vm351_vm0, %v1795_v43 }
 0x3a4   : > { %2473 = vmatmul.mubr.msk.f32.gmra.mrb[22].mxu1 %vm351_vm0, %v1827_v32 }
 0x452   : > { %v2465_v44 = vpop.f32.mrb[16].mxu1 }
 0x453   : > { %v1936_v52 = vpop.f32.mrb[17].mxu1 }
 0x462   : > { %v2468_v58 = vpop.f32.mrb[18].mxu1 }
 0x463   : > { %v1991_v63 = vcombine.low %v2465_v44, %v2468_v58  ;;  %v1992_v0 = vcombine.high %v2465_v44, %v2468_v58  ;;  %v1946_v55 = vpop.f32.mrb[19].mxu1 }
 0x464   : > { %v1975_v1 = vcombine.low %v1936_v52, %v1946_v55  ;;  %v1976_v2 = vcombine.high %v1936_v52, %v1946_v55 }
 0x465   : > { %v1999_v3 = vrot.slane %v1991_v63, %v3178_v7  ;;  %v2006_v4 = vrot.slane %v1992_v0, %v3178_v7 }
 0x466   : > { %v1983_v5 = vrot.slane %v1975_v1, %v3178_v7  ;;  %v1990_v16 = vrot.slane %v1976_v2, %v3178_v7 }
 0x467   : > { %v2471_v56 = vpop.f32.mrb[20].mxu1 }
 0x468   : > { %v2039_v8 = vcombine.low %v1983_v5, %v1999_v3  ;;  %v2040_v9 = vcombine.high %v1983_v5, %v1999_v3  ;;  %v2055_v10 = vcombine.low %v1990_v16, %v2006_v4  ;;  %v2056_v11 = vcombine.high %v1990_v16, %v2006_v4  ;;  %v1956_v12 = vpop.f32.mrb[21].mxu1 }
 0x46a   : > { %v2054_v22 = vrot.slane %v2040_v9, %v3184_v18  ;;  %v2047_v23 = vrot.slane %v2039_v8, %v3184_v18  ;;  %v2063_v24 = vrot.slane %v2055_v10, %v3184_v18 }
 0x477   : > { %v2474_v13 = vpop.f32.mrb[22].mxu1 }
 0x478   : > { %v2023_v25 = vcombine.low %v2471_v56, %v2474_v13  ;;  %v2024_v17 = vcombine.high %v2471_v56, %v2474_v13  ;;  %v1966_v36 = vpop.f32.mrb[23].mxu1 }
 0x479   : > { %v2007_v37 = vcombine.low %v1956_v12, %v1966_v36  ;;  %v2008_v42 = vcombine.high %v1956_v12, %v1966_v36 }
 0x47a   : > { %v2031_v41 = vrot.slane %v2023_v25, %v3178_v7  ;;  %v2038_v6 = vrot.slane %v2024_v17, %v3178_v7 }
 0x47b   : > { %v2015_v53 = vrot.slane %v2007_v37, %v3178_v7  ;;  %v2022_v14 = vrot.slane %v2008_v42, %v3178_v7  ;;  %v2070_v7 = vrot.slane %v2056_v11, %v3184_v18 }
 0x47d   : > { %v2071_v15 = vcombine.low %v2015_v53, %v2031_v41  ;;  %v2072_v19 = vcombine.high %v2015_v53, %v2031_v41  ;;  %v2087_v20 = vcombine.low %v2022_v14, %v2038_v6  ;;  %v2088_v21 = vcombine.high %v2022_v14, %v2038_v6 }
 0x47f   : > { %v2086_v27 = vrot.slane %v2072_v19, %v3184_v18  ;;  %v2079_v28 = vrot.slane %v2071_v15, %v3184_v18  ;;  %v2095_v34 = vrot.slane %v2087_v20, %v3184_v18  ;;  %v2102_v35 = vrot.slane %v2088_v21, %v3184_v18 }
 0x481   : > { %v2105_v38 = vcombine.low %v2054_v22, %v2086_v27  ;;  %v2104_v39 = vcombine.high %v2047_v23, %v2079_v28  ;;  %v2107_v47 = vcombine.low %v2063_v24, %v2095_v34  ;;  %v2106_v46 = vcombine.high %v2054_v22, %v2086_v27 }
 0x482   : > { %v2109_v48 = vcombine.low %v2070_v7, %v2102_v35  ;;  %v2108_v49 = vcombine.high %v2063_v24, %v2095_v34  ;;  %v2110_v50 = vcombine.high %v2070_v7, %v2102_v35  ;;  %v2103_v54 = vcombine.low %v2047_v23, %v2079_v28 }
 0x483   : > { %2116 = vrot.lane.b32.xlu1 %v2105_v38, %s2828_s1  ;;  %2112 = vrot.lane.b32.xlu0 %v2104_v39, %s2829_s19 }
 0x487   : > { %2124 = vrot.lane.b32.xlu1 %v2107_v47, %s2823_s10  ;;  %2120 = vrot.lane.b32.xlu0 %v2106_v46, %s2830_s21 }
 0x48b   : > { %2132 = vrot.lane.b32.xlu1 %v2109_v48, %s2831_s28  ;;  %2128 = vrot.lane.b32.xlu0 %v2108_v49, %s2832_s22 }
 0x48f   : > { %2136 = vrot.lane.b32.xlu0 %v2110_v50, %s2833_s5 }
 0x4f5   : > { %v2117_v18 = vpop.permute.xlu1 %2116  ;;  %v2113_v60 = vpop.permute.xlu0 %2112 }
 0x4f6   : > { %v2140_v61 = vsel %vm2139_vm1, %v2103_v54, %v2113_v60 }
 0x4f7   : > { %v2142_v45 = vsel %vm2141_vm2, %v2140_v61, %v2117_v18 }
 0x4f9   : > { %v2125_v33 = vpop.permute.xlu1 %2124  ;;  %v2121_v40 = vpop.permute.xlu0 %2120 }
 0x4fa   : > { %v2144_v51 = vsel %vm2143_vm3, %v2142_v45, %v2121_v40 }
 0x4fb   : > { %v2145_v62 = vsel %vm351_vm0, %v2144_v51, %v2125_v33 }
 0x4fd   : > { %v2129_v59 = vpop.permute.xlu0 %2128  ;;  %v2133_v29 = vpop.permute.xlu1 %2132 }
 0x4fe   : > { %v2147_v30 = vsel %vm2146_vm4, %v2145_v62, %v2129_v59 }
 0x4ff   : > { %v2149_v26 = vsel %vm2148_vm5, %v2147_v30, %v2133_v29 }
 0x501   : > { %v2137_v57 = vpop.permute.xlu0 %2136 }
 0x502   : > { %v2151_v31 = vsel %vm2150_vm6, %v2149_v26, %v2137_v57 }
 0x503   : > { %2153 = vst.msk [vmem:[%s315_s7] sm:$0xff] %vm2152_vm7, %v2151_v31 }
 0x504   : > { %2737 = shalt.err (!%p2734_p12)
}
 0x505   : > { %s2738_s11 = scalar_lea.hbm %s3463_s23, 128  ;;  %s2742_s15 = scalar_lea.hbm %s3559_s12, 256 }
 0x506   : > { %p2739_p0 = scmp.ne.s32.totalorder %s3463_s23, %s2738_s11  ;;  %p2743_p9 = scmp.lt.u32.totalorder %s3463_s23, %s3559_s12 }
 0x507   : > { %p2744_p4 = scmp.lt.u32.totalorder %s2742_s15, %s2738_s11  ;;  %p2746_p5 = scmp.lt.u32.totalorder %s2738_s11, %s3463_s23 }
 0x508   : > { %p2740_p11 = pnand %p2739_p0, %p3560_p10 }
 0x509   : > { %p2745_p2 = por %p2744_p4, %p2743_p9 }
 0x50a   : > { %p2741_p1 = pneg %p2740_p11 }
 0x50b   : > { %p2747_p13 = por %p2746_p5, %p2745_p2 }
 0x50d   : > { %p2748_p7 = pnand %p2747_p13, %p2741_p1 }
 0x50f   : > { %2751 = shalt.err (!%p2748_p7)
}
 0x510   : > { %2519 = dma.vmem_to_hbm [thread:$0]  (%p3560_p10), %s3465_s30, 128, %s3463_s23, %s2155_s29  }
 0x511 PF: > { %s3561_s8 = sld [smem:[#allocation15_spill]]  ;;  %s3562_s1 = sld [smem:[#allocation20_spill]] }
 0x512   : > { %s3563_s19 = sld [smem:[#allocation17_spill]] }
 0x517   : > { %s2181_s21 = sand.u32 1, %s3561_s8   ;;  %p3564_p3 = scmp.ne.s32.totalorder %s3562_s1, 0 }
 0x518   : > { %p3565_p6 = scmp.ge.s32.totalorder %s3563_s19, 2  ;;  %s2182_s28 = scalar_lea.sflag [#allocation4], %s2181_s21 }
 0x51a   : > { %p2536_p8 = pnand %p3565_p6, %p3564_p3 }
 0x51c   : > { %2789 = dma.done.wait (!%p2536_p8), %s2182_s28, 128  }
 0x51d   : > { %2791 = vsyncadd (!%p2536_p8), %s2182_s28, 4294967168  ;;  %s24_s20 = sadd.s32 1, %s3563_s19   ;;  %s3566_s6 = sld [smem:[#allocation19_spill]] }
 0x51e   : > { %p21_p12 = scmp.ge.s32.totalorder %s24_s20, 4   ;;  %s3567_s18 = sld [smem:[#allocation16_spill]] }
 0x51f   : > { %s3568_s19 = sld [smem:[#allocation18_spill]]  ;;  %s3569_s15 = smov %s2798_s16 }
 0x520   : > { %s3570_s16 = smov %s2802_s17  ;;  %23 = sbr.rel (!%p21_p12) target bundleno = 12 (0xc), region = 109 }
 0x523   : > { %s3571_s17 = smov %s3566_s6 }
 0x527   :  { %2187 = vsyncpa [#allocation3], 1 }
 0x528   :  { %2189 = vsyncpa [#allocation3 + $0x1], 1 }
 0x529   :  { %2190 = vsyncpa [#allocation6], 1 }
 0x52a   :  { %2192 = vsyncpa [#allocation6 + $0x1], 1 }
 0x52b   :  { %2193 = vsyncpa [#allocation9], 1 }
 0x52c   :  { %2194 = vsyncpa [#allocation4], 1 }
 0x52d   :  { %2196 = vsyncpa [#allocation4 + $0x1], 1 }

</bundles_post_ra>
